<compile_context>
chip_gen: v7x
topology: tpu7x:2x2x1
jax: 0.10.0
libtpu: 0.0.40
codegen_flags: <defaults>
</compile_context>

<pallas_src>
import functools

import jax
import jax.numpy as jnp
from jax.experimental import pallas as pl
from jax.experimental.pallas import tpu as pltpu


def _round_up(n, m):
    return ((n + m - 1) // m) * m


def _probe_expm1():
    # expm1 lowering availability varies across Pallas TPU versions; probe once with a
    # tiny kernel and fall back to exp(x)-1 if it does not lower.
    try:
        def k(x_ref, o_ref):
            o_ref[...] = jnp.expm1(x_ref[...])

        jax.block_until_ready(
            pl.pallas_call(k, out_shape=jax.ShapeDtypeStruct((8, 128), jnp.float32))(
                jnp.zeros((8, 128), jnp.float32)))
        return True
    except Exception:  # any lowering/compile failure -> safe fallback
        return False


_HAS_EXPM1 = _probe_expm1()


def _elu(x):
    # torch ELU (alpha=1): x if x > 0 else expm1(x).
    neg = jnp.expm1(x) if _HAS_EXPM1 else jnp.exp(x) - 1.0
    return jnp.where(x > 0, x, neg)


def head_kernel(x_ref, w1_ref, b1_ref, w2_ref, b2_ref, w3_ref, b3_ref, o_ref):
    # Cast x to the MXU operand dtype *inside* the kernel (keeps the HBM x stream at its
    # native width; no wrapper pad/cast pass).
    x = x_ref[...].astype(w1_ref.dtype)

    # dense_1: MXU with f32 accumulation; bias + ELU in the elementwise dtype
    # (bf16 on v6e/v7x, f32 on v5e -- encoded as the bias dtype by prepare_head_params).
    h = jnp.dot(x, w1_ref[...], preferred_element_type=jnp.float32)
    h = _elu(h.astype(b1_ref.dtype) + b1_ref[...])

    # dense_2 + ELU (h already in the MXU operand dtype when elementwise dtype == bf16).
    h = jnp.dot(h.astype(w2_ref.dtype), w2_ref[...], preferred_element_type=jnp.float32)
    h = _elu(h.astype(b2_ref.dtype) + b2_ref[...])

    # output layer: f32 accumulation + f32 bias, lane-dense f32 store (Np multiple of 128).
    y = jnp.dot(h.astype(w3_ref.dtype), w3_ref[...], preferred_element_type=jnp.float32)
    o_ref[...] = (y + b3_ref[...]).astype(o_ref.dtype)


def _pad2(a, rows, cols, dtype):
    a = a.astype(dtype)
    return jnp.pad(a, ((0, rows - a.shape[0]), (0, cols - a.shape[1])))


def _default_elementwise_dtype(mxu_dtype):
    if jnp.dtype(mxu_dtype) == jnp.dtype(jnp.float32):
        return jnp.float32
    try:
        kind = jax.devices()[0].device_kind.lower()
    except Exception:
        kind = ""
    # v6e/v7x have bf16 VALU/EUP -> bf16 elementwise chain; v5e and older stay f32.
    if any(tag in kind for tag in ("v6", "v7", "7x")):
        return jnp.bfloat16
    return jnp.float32


def prepare_head_params(params, *, mxu_dtype=jnp.bfloat16, elementwise_dtype=None):
    """One-time pad + cast of the Head weights/biases for the Pallas kernel.

    Hidden/output feature dims are zero-padded to multiples of 128 (lane-dense); padding
    is exact because ELU(0) = 0 and zero weight rows/cols contribute nothing. x's feature
    dim (w1 rows) is left at its true size so x needs no wrapper-side padding.
    """
    if elementwise_dtype is None:
        elementwise_dtype = _default_elementwise_dtype(mxu_dtype)
    in_dims, hid = params["w1"].shape
    out_dims = params["w3"].shape[1]
    Hp = _round_up(hid, 128)
    Np = _round_up(out_dims, 128)
    return {
        "w1": _pad2(params["w1"], in_dims, Hp, mxu_dtype),
        "w2": _pad2(params["w2"], Hp, Hp, mxu_dtype),
        "w3": _pad2(params["w3"], Hp, Np, mxu_dtype),
        "b1": _pad2(params["b1"].reshape(1, -1), 1, Hp, elementwise_dtype),
        "b2": _pad2(params["b2"].reshape(1, -1), 1, Hp, elementwise_dtype),
        "b3": _pad2(params["b3"].reshape(1, -1), 1, Np, jnp.float32),
    }


@functools.partial(jax.jit, static_argnames=("out_dims", "tile_b"))
def head_forward(x, params, *, out_dims, tile_b=1024):
    """x: (B, input_dims) float. params: output of prepare_head_params.
    Returns (B, out_dims) float32."""
    B, in_dims = x.shape
    Hp = params["w1"].shape[1]
    Np = params["w3"].shape[1]

    # Row tile: multiple of 8 (sublane), capped so the batch grid has >= 2 steps when
    # possible (keeps both v7x TensorCores busy on the "parallel" axis).
    if B <= 8:
        tile_rows = B                                    # full-dim block
    else:
        tile_rows = min(_round_up(tile_b, 8), _round_up(-(-B // 2), 8))
    grid = (pl.cdiv(B, tile_rows),)

    mxu_itm = jnp.dtype(params["w1"].dtype).itemsize
    x_itm = jnp.dtype(x.dtype).itemsize
    weight_bytes = (in_dims * Hp + Hp * Hp + Hp * Np) * mxu_itm
    bias_bytes = (2 * Hp + Np) * 4

    # VMEM budget: double-buffered x/out tiles + resident weights/biases (allocated
    # double-buffered by default) + activation headroom. Stays far below v7x's 64 MiB.
    vmem_bytes = (
        2 * tile_rows * in_dims * x_itm
        + 2 * tile_rows * Np * 4
        + 2 * (weight_bytes + bias_bytes)
        + 3 * tile_rows * Hp * 4
    )
    vmem_limit = int(min(max(vmem_bytes + (8 << 20), 32 << 20), 56 << 20))

    cost = pl.CostEstimate(
        flops=2 * B * (in_dims * Hp + Hp * Hp + Hp * Np),
        transcendentals=2 * B * Hp,  # exp in the two ELUs
        bytes_accessed=int(x.size * x_itm + weight_bytes + bias_bytes + B * Np * 4),
    )

    # Resident operands: constant index_map -> DMA'd once, reused across grid steps.
    # NOTE: at much larger hidden dims on v7x, add pipeline_mode=pl.Buffered(1) here to
    # single-buffer the never-changing weight blocks and halve their VMEM footprint.
    def resident(a):
        nd = a.ndim
        return pl.BlockSpec(a.shape, lambda i, nd=nd: (0,) * nd)

    out_padded = pl.pallas_call(
        head_kernel,
        out_shape=jax.ShapeDtypeStruct((B, Np), jnp.float32),
        grid=grid,
        in_specs=[
            pl.BlockSpec((tile_rows, in_dims), lambda i: (i, 0)),  # x: row-tiled, unpadded
            resident(params["w1"]), resident(params["b1"]),
            resident(params["w2"]), resident(params["b2"]),
            resident(params["w3"]), resident(params["b3"]),
        ],
        out_specs=pl.BlockSpec((tile_rows, Np), lambda i: (i, 0)),
        compiler_params=pltpu.CompilerParams(
            dimension_semantics=("parallel",),
            vmem_limit_bytes=vmem_limit,
        ),
        cost_estimate=cost,
    )(x, params["w1"], params["b1"], params["w2"], params["b2"],
      params["w3"], params["b3"])

    # Only the column slice remains (output rows are exactly B); a fused consumer could
    # take the padded (B, Np) block directly and skip this pass.
    return out_padded[:, :out_dims]


def xavier_uniform(key, fan_in, fan_out, dtype=jnp.float32):
    # Matches torch.nn.init.xavier_uniform_ bounds.
    bound = (6.0 / (fan_in + fan_out)) ** 0.5
    return jax.random.uniform(key, (fan_in, fan_out), dtype, minval=-bound, maxval=bound)


def init_head_params(key, input_dims, output_dims, hidden_dims):
    k1, k2, k3 = jax.random.split(key, 3)
    return {
        "w1": xavier_uniform(k1, input_dims, hidden_dims),
        "b1": jnp.zeros((1, hidden_dims), jnp.float32),
        "w2": xavier_uniform(k2, hidden_dims, hidden_dims),
        "b2": jnp.zeros((1, hidden_dims), jnp.float32),
        "w3": xavier_uniform(k3, hidden_dims, output_dims),
        "b3": jnp.zeros((1, output_dims), jnp.float32),
    }


def head_reference(x, p):
    h = _elu(x @ p["w1"] + p["b1"])
    h = _elu(h @ p["w2"] + p["b2"])
    return h @ p["w3"] + p["b3"]


if __name__ == "__main__":
    key = jax.random.PRNGKey(0)
    k_x, k_x2, k_p = jax.random.split(key, 3)

    batch = 8
    input_dims = 32
    hidden_dims = 256   # module default; multiple of 128 keeps MXU/lane layout dense
    output_dims = 16

    params = init_head_params(k_p, input_dims, output_dims, hidden_dims)

    # 1) f32 MXU + f32 elementwise, single grid step — tight tolerance vs. f32 reference.
    prep_f32 = prepare_head_params(params, mxu_dtype=jnp.float32)
    x = jax.random.normal(k_x, (batch, input_dims), jnp.float32)
    out_f32 = jax.block_until_ready(head_forward(x, prep_f32, out_dims=output_dims))
    ref = head_reference(x, params)
    assert out_f32.shape == (batch, output_dims)
    assert jnp.allclose(out_f32, ref, atol=1e-4, rtol=1e-4), "f32 path mismatch vs reference"

    # 2) bf16 MXU path with an odd batch -> multi-step grid + masked partial last block.
    batch2 = 300
    prep_bf16 = prepare_head_params(params, mxu_dtype=jnp.bfloat16)
    x2 = jax.random.normal(k_x2, (batch2, input_dims), jnp.float32)
    out_bf16 = jax.block_until_ready(
        head_forward(x2, prep_bf16, out_dims=output_dims, tile_b=128))
    ref2 = head_reference(x2, params)
    assert out_bf16.shape == (batch2, output_dims)
    assert jnp.allclose(out_bf16, ref2, atol=5e-2, rtol=5e-2), "bf16 path mismatch vs reference"

    # TODO(synk): xor_output=True branch (SoftXOR output layer) not implemented; default nn.Linear path only.
    print("KERNEL_OK")
</pallas_src>

<mosaic_0001>
module attributes {stable_mosaic.version = 11 : i64} {
  func.func @head_kernel(%arg0: i32, %arg1: memref<8x32xf32, #tpu.memory_space<vmem>>, %arg2: memref<32x256xf32, #tpu.memory_space<vmem>>, %arg3: memref<1x256xf32, #tpu.memory_space<vmem>>, %arg4: memref<256x256xf32, #tpu.memory_space<vmem>>, %arg5: memref<1x256xf32, #tpu.memory_space<vmem>>, %arg6: memref<256x128xf32, #tpu.memory_space<vmem>>, %arg7: memref<1x128xf32, #tpu.memory_space<vmem>>, %arg8: memref<8x128xf32, #tpu.memory_space<vmem>>) attributes {dimension_semantics = [#tpu.dimension_semantics<parallel>], iteration_bounds = array<i64: 1>, scalar_prefetch = 0 : i64, scratch_operands = 0 : i64, tpu.core_type = #tpu.core_type<tc>, window_params = [{transform_indices = @transform_0, window_bounds = array<i64: 8, 32>}, {pipeline_mode = #tpu.pipeline_mode<synchronous>, transform_indices = @transform_1, window_bounds = array<i64: 32, 256>}, {pipeline_mode = #tpu.pipeline_mode<synchronous>, transform_indices = @transform_2, window_bounds = array<i64: 1, 256>}, {pipeline_mode = #tpu.pipeline_mode<synchronous>, transform_indices = @transform_3, window_bounds = array<i64: 256, 256>}, {pipeline_mode = #tpu.pipeline_mode<synchronous>, transform_indices = @transform_4, window_bounds = array<i64: 1, 256>}, {pipeline_mode = #tpu.pipeline_mode<synchronous>, transform_indices = @transform_5, window_bounds = array<i64: 256, 128>}, {pipeline_mode = #tpu.pipeline_mode<synchronous>, transform_indices = @transform_6, window_bounds = array<i64: 1, 128>}, {transform_indices = @transform_7, window_bounds = array<i64: 8, 128>}]} {
    %c0 = arith.constant 0 : index
    %c0_0 = arith.constant 0 : index
    %0 = vector.load %arg1[%c0, %c0_0] : memref<8x32xf32, #tpu.memory_space<vmem>>, vector<8x32xf32>
    %c0_1 = arith.constant 0 : index
    %c0_2 = arith.constant 0 : index
    %1 = vector.load %arg2[%c0_1, %c0_2] : memref<32x256xf32, #tpu.memory_space<vmem>>, vector<32x256xf32>
    %cst = arith.constant dense<0.000000e+00> : vector<8x256xf32>
    %2 = tpu.matmul %0, %1, %cst {dimension_numbers = #tpu.dot_dimension_numbers<[1], [0], [0], [1], [0, 0, 1, 1], [], []>} : vector<8x32xf32>, vector<32x256xf32>, vector<8x256xf32> -> vector<8x256xf32>
    %c0_3 = arith.constant 0 : index
    %c0_4 = arith.constant 0 : index
    %3 = vector.load %arg3[%c0_3, %c0_4] : memref<1x256xf32, #tpu.memory_space<vmem>>, vector<1x256xf32>
    %4 = vector.broadcast %3 : vector<1x256xf32> to vector<8x256xf32>
    %5 = arith.addf %2, %4 : vector<8x256xf32>
    %6 = math.exp %5 : vector<8x256xf32>
    %cst_5 = arith.constant 1.000000e+00 : f32
    %7 = vector.broadcast %cst_5 : f32 to vector<8x256xf32>
    %8 = arith.subf %6, %7 : vector<8x256xf32>
    %cst_6 = arith.constant 0.000000e+00 : f32
    %9 = vector.broadcast %cst_6 : f32 to vector<8x256xf32>
    %10 = arith.cmpf ogt, %5, %9 : vector<8x256xf32>
    %11 = arith.select %10, %5, %8 : vector<8x256xi1>, vector<8x256xf32>
    %c0_7 = arith.constant 0 : index
    %c0_8 = arith.constant 0 : index
    %12 = vector.load %arg4[%c0_7, %c0_8] : memref<256x256xf32, #tpu.memory_space<vmem>>, vector<256x256xf32>
    %cst_9 = arith.constant dense<0.000000e+00> : vector<8x256xf32>
    %13 = tpu.matmul %11, %12, %cst_9 {dimension_numbers = #tpu.dot_dimension_numbers<[1], [0], [0], [1], [0, 0, 1, 1], [], []>} : vector<8x256xf32>, vector<256x256xf32>, vector<8x256xf32> -> vector<8x256xf32>
    %c0_10 = arith.constant 0 : index
    %c0_11 = arith.constant 0 : index
    %14 = vector.load %arg5[%c0_10, %c0_11] : memref<1x256xf32, #tpu.memory_space<vmem>>, vector<1x256xf32>
    %15 = vector.broadcast %14 : vector<1x256xf32> to vector<8x256xf32>
    %16 = arith.addf %13, %15 : vector<8x256xf32>
    %17 = math.exp %16 : vector<8x256xf32>
    %cst_12 = arith.constant 1.000000e+00 : f32
    %18 = vector.broadcast %cst_12 : f32 to vector<8x256xf32>
    %19 = arith.subf %17, %18 : vector<8x256xf32>
    %cst_13 = arith.constant 0.000000e+00 : f32
    %20 = vector.broadcast %cst_13 : f32 to vector<8x256xf32>
    %21 = arith.cmpf ogt, %16, %20 : vector<8x256xf32>
    %22 = arith.select %21, %16, %19 : vector<8x256xi1>, vector<8x256xf32>
    %c0_14 = arith.constant 0 : index
    %c0_15 = arith.constant 0 : index
    %23 = vector.load %arg6[%c0_14, %c0_15] : memref<256x128xf32, #tpu.memory_space<vmem>>, vector<256x128xf32>
    %cst_16 = arith.constant dense<0.000000e+00> : vector<8x128xf32>
    %24 = tpu.matmul %22, %23, %cst_16 {dimension_numbers = #tpu.dot_dimension_numbers<[1], [0], [0], [1], [0, 0, 1, 1], [], []>} : vector<8x256xf32>, vector<256x128xf32>, vector<8x128xf32> -> vector<8x128xf32>
    %c0_17 = arith.constant 0 : index
    %c0_18 = arith.constant 0 : index
    %25 = vector.load %arg7[%c0_17, %c0_18] : memref<1x128xf32, #tpu.memory_space<vmem>>, vector<1x128xf32>
    %26 = vector.broadcast %25 : vector<1x128xf32> to vector<8x128xf32>
    %27 = arith.addf %24, %26 : vector<8x128xf32>
    %c0_19 = arith.constant 0 : index
    %c0_20 = arith.constant 0 : index
    %28 = vector.load %arg8[%c0_19, %c0_20] : memref<8x128xf32, #tpu.memory_space<vmem>>, vector<8x128xf32>
    tpu.vector_store %arg8[%c0_19, %c0_20], %27 {strides = array<i32>} : memref<8x128xf32, #tpu.memory_space<vmem>>, vector<8x128xf32>,
    return
  }
  func.func @transform_0(%arg0: i32) -> (i32, i32) {
    %c0_i32 = arith.constant 0 : i32
    %c0_i32_0 = arith.constant 0 : i32
    return %arg0, %c0_i32 : i32, i32
  }
  func.func @transform_1(%arg0: i32) -> (i32, i32) {
    %c0_i32 = arith.constant 0 : i32
    %c0_i32_0 = arith.constant 0 : i32
    %c0_i32_1 = arith.constant 0 : i32
    return %c0_i32, %c0_i32_0 : i32, i32
  }
  func.func @transform_2(%arg0: i32) -> (i32, i32) {
    %c0_i32 = arith.constant 0 : i32
    %c0_i32_0 = arith.constant 0 : i32
    %c0_i32_1 = arith.constant 0 : i32
    return %c0_i32, %c0_i32_0 : i32, i32
  }
  func.func @transform_3(%arg0: i32) -> (i32, i32) {
    %c0_i32 = arith.constant 0 : i32
    %c0_i32_0 = arith.constant 0 : i32
    %c0_i32_1 = arith.constant 0 : i32
    return %c0_i32, %c0_i32_0 : i32, i32
  }
  func.func @transform_4(%arg0: i32) -> (i32, i32) {
    %c0_i32 = arith.constant 0 : i32
    %c0_i32_0 = arith.constant 0 : i32
    %c0_i32_1 = arith.constant 0 : i32
    return %c0_i32, %c0_i32_0 : i32, i32
  }
  func.func @transform_5(%arg0: i32) -> (i32, i32) {
    %c0_i32 = arith.constant 0 : i32
    %c0_i32_0 = arith.constant 0 : i32
    %c0_i32_1 = arith.constant 0 : i32
    return %c0_i32, %c0_i32_0 : i32, i32
  }
  func.func @transform_6(%arg0: i32) -> (i32, i32) {
    %c0_i32 = arith.constant 0 : i32
    %c0_i32_0 = arith.constant 0 : i32
    %c0_i32_1 = arith.constant 0 : i32
    return %c0_i32, %c0_i32_0 : i32, i32
  }
  func.func @transform_7(%arg0: i32) -> (i32, i32) {
    %c0_i32 = arith.constant 0 : i32
    %c0_i32_0 = arith.constant 0 : i32
    return %arg0, %c0_i32 : i32, i32
  }
}

</mosaic_0001>

<bundles_post_ra>
// kernel: head_forward.1
= control target key start
LH: loop header
LB: loop body
LE: loop exit
PB: predicated region body
PF: predicated region fallthrough
CT: control target
= control target key end

     0   :  { %12 = vsyncpa [#allocation3], 0  ;;  %s888_s0 = inlined_call_operand.hbm [shape: f32[8,32], index: 0, kind: input, shape index: {}]   ;;  %s889_s1 = inlined_call_operand.hbm [shape: f32[32,256], index: 1, kind: input, shape index: {}]   ;;  %s890_s2 = inlined_call_operand.vmem [shape: f32[1,256], index: 2, kind: input, shape index: {}]   ;;  %s891_s3 = inlined_call_operand.hbm [shape: f32[256,256], index: 3, kind: input, shape index: {}]   ;;  %s892_s4 = inlined_call_operand.vmem [shape: f32[1,256], index: 4, kind: input, shape index: {}]   ;;  %s893_s5 = inlined_call_operand.hbm [shape: f32[256,128], index: 5, kind: input, shape index: {}]   ;;  %s894_s6 = inlined_call_operand.vmem [shape: f32[1,128], index: 6, kind: input, shape index: {}]   ;;  %s895_s7 = inlined_call_operand.hbm [shape: f32[8,128], index: 7, kind: output, shape index: {}]  }
   0x1   :  { %13 = vsyncpa [#allocation6], 0 }
   0x2   :  { %14 = vsyncpa [#allocation9], 0 }
   0x3   :  { %15 = vsyncpa [#allocation4], 0  ;;  %s751_s24 = smov [#allocation5]   ;;  %s633_s28 = scalar_lea.hbm %s889_s1, 1024 }
   0x4   :  { %s31_s25 = sshll.u32 %s751_s24, 4  ;;  %p634_p0 = scmp.ne.s32.totalorder %s889_s1, %s633_s28  ;;  %s32_s25 = int_to_ptr.vmem [resolvable:$true] %s31_s25 }
   0x5   :  { %p637_p1 = scmp.lt.u32.totalorder %s633_s28, %s889_s1 }
   0x7   :  { %p639_p2 = pnand %p637_p1, %p634_p0 }
   0x9   :  { %642 = shalt.err (!%p639_p2)
}
   0xa   :  { %s643_s10 = scalar_lea.vmem %s32_s25, 1024  ;;  %p648_p4 = scmp.lt.s32.totalorder %s32_s25, %s32_s25 }
   0xb   :  { %p644_p3 = scmp.ne.s32.totalorder %s32_s25, %s643_s10  ;;  %p649_p5 = scmp.lt.s32.totalorder %s643_s10, %s643_s10 }
   0xd   :  { %p650_p6 = por %p649_p5, %p648_p4 }
   0xf   :  { %p651_p7 = pnand %p650_p6, %p644_p3 }
  0x11   :  { %654 = shalt.err (!%p651_p7)
}
  0x12   :  { %s752_s11 = smov 256   ;;  %s753_s12 = smov 16  }
  0x13   :  { %37 = dma.hbm_to_vmem [thread:$0]  %s889_s1, 1024, %s32_s25, [#allocation6], %s752_s11, %s752_s11, %s753_s12  }
  0x14   :  { %s754_s15 = smov [#allocation2]   ;;  %s755_s17 = smov [#allocation7]  }
  0x15   :  { %s22_s16 = sshll.u32 %s754_s15, 4  ;;  %s45_s18 = sshll.u32 %s755_s17, 4  ;;  %s23_s16 = int_to_ptr.vmem [resolvable:$true] %s22_s16  ;;  %s46_s18 = int_to_ptr.vmem [resolvable:$true] %s45_s18 }
  0x16   :  { %s655_s21 = scalar_lea.hbm %s888_s0, 128 }
  0x17   :  { %p656_p8 = scmp.ne.s32.totalorder %s888_s0, %s655_s21  ;;  %p659_p9 = scmp.lt.u32.totalorder %s655_s21, %s888_s0 }
  0x19   :  { %p661_p10 = pnand %p659_p9, %p656_p8 }
  0x1b   :  { %664 = shalt.err (!%p661_p10)
}
  0x1c   :  { %s665_s1 = scalar_lea.vmem %s23_s16, 128  ;;  %p670_p12 = scmp.lt.s32.totalorder %s23_s16, %s23_s16 }
  0x1d   :  { %p666_p11 = scmp.ne.s32.totalorder %s23_s16, %s665_s1  ;;  %p671_p13 = scmp.lt.s32.totalorder %s665_s1, %s665_s1 }
  0x1f   :  { %p672_p0 = por %p671_p13, %p670_p12 }
  0x21   :  { %p673_p1 = pnand %p672_p0, %p666_p11 }
  0x23   :  { %676 = shalt.err (!%p673_p1)
}
  0x24   :  { %25 = dma.hbm_to_vmem [thread:$0]  %s888_s0, 128, %s23_s16, [#allocation3]  }
  0x25   :  { %s677_s30 = scalar_lea.hbm %s891_s3, 8192 }
  0x26   :  { %p678_p2 = scmp.ne.s32.totalorder %s891_s3, %s677_s30  ;;  %p681_p3 = scmp.lt.u32.totalorder %s677_s30, %s891_s3 }
  0x28   :  { %p683_p4 = pnand %p681_p3, %p678_p2 }
  0x2a   :  { %686 = shalt.err (!%p683_p4)
}
  0x2b   :  { %s687_s14 = scalar_lea.vmem %s46_s18, 8192  ;;  %p692_p6 = scmp.lt.s32.totalorder %s46_s18, %s46_s18 }
  0x2c   :  { %p688_p5 = scmp.ne.s32.totalorder %s46_s18, %s687_s14  ;;  %p693_p7 = scmp.lt.s32.totalorder %s687_s14, %s687_s14 }
  0x2e   :  { %p694_p8 = por %p693_p7, %p692_p6 }
  0x30   :  { %p695_p9 = pnand %p694_p8, %p688_p5 }
  0x32   :  { %698 = shalt.err (!%p695_p9)
}
  0x33   :  { %51 = dma.hbm_to_vmem [thread:$0]  %s891_s3, 8192, %s46_s18, [#allocation6], %s752_s11, %s752_s11, %s753_s12  }
  0x34   :  { %s756_s16 = smov [#allocation8]   ;;  %s699_s21 = scalar_lea.hbm %s893_s5, 4096 }
  0x35   :  { %s59_s17 = sshll.u32 %s756_s16, 4  ;;  %p700_p10 = scmp.ne.s32.totalorder %s893_s5, %s699_s21  ;;  %s60_s17 = int_to_ptr.vmem [resolvable:$true] %s59_s17 }
  0x36   :  { %p703_p11 = scmp.lt.u32.totalorder %s699_s21, %s893_s5 }
  0x38   :  { %p705_p12 = pnand %p703_p11, %p700_p10 }
  0x3a   :  { %708 = shalt.err (!%p705_p12)
}
  0x3b   :  { %s709_s1 = scalar_lea.vmem %s60_s17, 4096  ;;  %p714_p0 = scmp.lt.s32.totalorder %s60_s17, %s60_s17 }
  0x3c   :  { %p710_p13 = scmp.ne.s32.totalorder %s60_s17, %s709_s1  ;;  %p715_p1 = scmp.lt.s32.totalorder %s709_s1, %s709_s1 }
  0x3e   :  { %p716_p2 = por %p715_p1, %p714_p0 }
  0x40   :  { %p717_p3 = pnand %p716_p2, %p710_p13 }
  0x42   :  { %720 = shalt.err (!%p717_p3)
}
  0x43   :  { %s757_s3 = smov 128   ;;  %s758_s11 = smov 8  }
  0x44   :  { %65 = dma.hbm_to_vmem [thread:$0]  %s893_s5, 4096, %s60_s17, [#allocation9], %s757_s3, %s757_s3, %s758_s11  }
  0x45   :  { %743 = dma.done.wait [#allocation3], 128  }
  0x46   :  { %744 = vsyncadd [#allocation3], 4294967168 }
  0x47   :  { %745 = dma.done.wait [#allocation6], 9216  }
  0x48   :  { %746 = vsyncadd [#allocation6], 4294958080 }
  0x49   :  { %747 = dma.done.wait [#allocation9], 4096  }
  0x4a   :  { %748 = vsyncadd [#allocation9], 4294963200  ;;  %v759_v0 = vmov 0.0   ;;  %v82_v1 = vld [vmem:[#allocation5 + $0x8] sm:$0xff]  ;;  %v84_v2 = vld [vmem:[#allocation5 + $0x18] sm:$0xff]  ;;  %vm101_vm0 = vcmask 261120  }
  0x4b   :  { %169 = vmatprep.mubr.f32.mxu0 %v759_v0  ;;  %v81_v3 = vld [vmem:[#allocation5] sm:$0xff]  ;;  %v511_v4 = vpack.c.bf16 %v84_v2, %v82_v1  ;;  %v83_v5 = vld [vmem:[#allocation5 + $0x10] sm:$0xff]  ;;  %v86_v6 = vld [vmem:[#allocation5 + $0x28] sm:$0xff]  ;;  %s760_s29 = smov [#allocation10]  }
  0x4c   :  { %v88_v7 = vld [vmem:[#allocation5 + $0x38] sm:$0xff]  ;;  %v513_v8 = vpack.c.bf16 %v83_v5, %v81_v3  ;;  %v85_v10 = vld [vmem:[#allocation5 + $0x20] sm:$0xff]  ;;  %v87_v11 = vld [vmem:[#allocation5 + $0x30] sm:$0xff]  ;;  %s459_s30 = sshll.u32 %s760_s29, 4  ;;  %s460_s30 = int_to_ptr.vmem [resolvable:$true] %s459_s30 }
  0x4d   :  { %v515_v9 = vpack.c.bf16 %v88_v7, %v86_v6  ;;  %512 = vmatprep.subr.bf16.mxu0 %v511_v4  ;;  %v187_v12 = vld [vmem:[#allocation7 + $0x8] sm:$0xff]  ;;  %v189_v13 = vld [vmem:[#allocation7 + $0x18] sm:$0xff]  ;;  %v186_v14 = vld [vmem:[#allocation7] sm:$0xff]  ;;  %v517_v15 = vpack.c.bf16 %v87_v11, %v85_v10  ;;  %s721_s8 = scalar_lea.vmem %s460_s30, 128  ;;  %p726_p5 = scmp.lt.s32.totalorder %s460_s30, %s460_s30 }
  0x4e   :  { %514 = vmatpush1.bf16.msra.mxu0 %v513_v8  ;;  %v519_v16 = vpack.c.bf16 %v189_v13, %v187_v12  ;;  %v188_v17 = vld [vmem:[#allocation7 + $0x10] sm:$0xff]  ;;  %v191_v18 = vld [vmem:[#allocation7 + $0x28] sm:$0xff]  ;;  %v193_v19 = vld [vmem:[#allocation7 + $0x38] sm:$0xff]  ;;  %p722_p4 = scmp.ne.s32.totalorder %s460_s30, %s721_s8  ;;  %p727_p6 = scmp.lt.s32.totalorder %s721_s8, %s721_s8 }
  0x4f   :  { %516 = vmatprep.subr.bf16.mxu0 %v515_v9  ;;  %v521_v20 = vpack.c.bf16 %v188_v17, %v186_v14  ;;  %v523_v21 = vpack.c.bf16 %v193_v19, %v191_v18  ;;  %v190_v22 = vld [vmem:[#allocation7 + $0x20] sm:$0xff]  ;;  %v192_v23 = vld [vmem:[#allocation7 + $0x30] sm:$0xff]  ;;  %v195_v24 = vld [vmem:[#allocation7 + $0x48] sm:$0xff] }
  0x50   :  { %520 = vmatprep.subr.bf16.mxu1 %v519_v16  ;;  %v197_v25 = vld [vmem:[#allocation7 + $0x58] sm:$0xff]  ;;  %v525_v26 = vpack.c.bf16 %v192_v23, %v190_v22  ;;  %v194_v29 = vld [vmem:[#allocation7 + $0x40] sm:$0xff]  ;;  %v196_v30 = vld [vmem:[#allocation7 + $0x50] sm:$0xff]  ;;  %p728_p7 = por %p727_p6, %p726_p5 }
  0x51   :  { %522 = vmatpush1.bf16.msra.mxu1 %v521_v20  ;;  %v80_v27 = vld [vmem:[#allocation2] sm:$0xff]  ;;  %v527_v28 = vpack.c.bf16 %v197_v25, %v195_v24  ;;  %v199_v31 = vld [vmem:[#allocation7 + $0x68] sm:$0xff]  ;;  %v529_v33 = vpack.c.bf16 %v196_v30, %v194_v29  ;;  %v198_v35 = vld [vmem:[#allocation7 + $0x60] sm:$0xff] }
  0x52   :  { %518 = vmatpush1.bf16.msra.mxu0 %v517_v15  ;;  %524 = vmatprep.subr.bf16.mxu1 %v523_v21  ;;  %v201_v32 = vld [vmem:[#allocation7 + $0x78] sm:$0xff]  ;;  %v200_v36 = vld [vmem:[#allocation7 + $0x70] sm:$0xff]  ;;  %v203_v37 = vld [vmem:[#allocation7 + $0x88] sm:$0xff]  ;;  %p729_p8 = pnand %p728_p7, %p722_p4 }
  0x53   :  { %v531_v34 = vpack.c.bf16 %v201_v32, %v199_v31  ;;  %v205_v38 = vld [vmem:[#allocation7 + $0x98] sm:$0xff]  ;;  %v533_v39 = vpack.c.bf16 %v200_v36, %v198_v35  ;;  %v202_v41 = vld [vmem:[#allocation7 + $0x80] sm:$0xff]  ;;  %v204_v42 = vld [vmem:[#allocation7 + $0x90] sm:$0xff] }
  0x54   :  { %v535_v40 = vpack.c.bf16 %v205_v38, %v203_v37  ;;  %v207_v43 = vld [vmem:[#allocation7 + $0xa8] sm:$0xff]  ;;  %v209_v44 = vld [vmem:[#allocation7 + $0xb8] sm:$0xff]  ;;  %v537_v45 = vpack.c.bf16 %v204_v42, %v202_v41  ;;  %v206_v47 = vld [vmem:[#allocation7 + $0xa0] sm:$0xff] }
  0x55   :  { %470 = vmatmul.mubr.msk.f32.vlgmr.msra.gmra.mrb[0].mxu0 %vm101_vm0, %v80_v27  ;;  %526 = vmatpush1.bf16.msra.mxu1 %v525_v26  ;;  %v539_v46 = vpack.c.bf16 %v209_v44, %v207_v43  ;;  %v208_v48 = vld [vmem:[#allocation7 + $0xb0] sm:$0xff]  ;;  %v211_v49 = vld [vmem:[#allocation7 + $0xc8] sm:$0xff]  ;;  %v213_v50 = vld [vmem:[#allocation7 + $0xd8] sm:$0xff] }
  0x56   :  { %528 = vmatprep.subr.bf16.mxu1 %v527_v28  ;;  %v541_v51 = vpack.c.bf16 %v208_v48, %v206_v47  ;;  %v543_v52 = vpack.c.bf16 %v213_v50, %v211_v49  ;;  %v210_v53 = vld [vmem:[#allocation7 + $0xc0] sm:$0xff]  ;;  %v212_v54 = vld [vmem:[#allocation7 + $0xd0] sm:$0xff]  ;;  %v215_v55 = vld [vmem:[#allocation7 + $0xe8] sm:$0xff] }
  0x57   :  { %v217_v56 = vld [vmem:[#allocation7 + $0xf8] sm:$0xff]  ;;  %v545_v57 = vpack.c.bf16 %v212_v54, %v210_v53  ;;  %v214_v59 = vld [vmem:[#allocation7 + $0xe0] sm:$0xff]  ;;  %v216_v60 = vld [vmem:[#allocation7 + $0xf0] sm:$0xff] }
  0x58   :  { %v547_v58 = vpack.c.bf16 %v217_v56, %v215_v55  ;;  %v219_v61 = vld [vmem:[#allocation7 + $0x108] sm:$0xff]  ;;  %v221_v62 = vld [vmem:[#allocation7 + $0x118] sm:$0xff]  ;;  %v549_v63 = vpack.c.bf16 %v216_v60, %v214_v59  ;;  %v218_v1 = vld [vmem:[#allocation7 + $0x100] sm:$0xff] }
  0x59   :  { %530 = vmatpush1.bf16.msra.mxu1 %v529_v33  ;;  %v551_v0 = vpack.c.bf16 %v221_v62, %v219_v61  ;;  %v220_v2 = vld [vmem:[#allocation7 + $0x110] sm:$0xff]  ;;  %v223_v3 = vld [vmem:[#allocation7 + $0x128] sm:$0xff]  ;;  %v225_v4 = vld [vmem:[#allocation7 + $0x138] sm:$0xff] }
  0x5a   :  { %532 = vmatprep.subr.bf16.mxu1 %v531_v34  ;;  %v553_v5 = vpack.c.bf16 %v220_v2, %v218_v1  ;;  %v555_v6 = vpack.c.bf16 %v225_v4, %v223_v3  ;;  %v222_v7 = vld [vmem:[#allocation7 + $0x120] sm:$0xff]  ;;  %v224_v8 = vld [vmem:[#allocation7 + $0x130] sm:$0xff]  ;;  %v227_v9 = vld [vmem:[#allocation7 + $0x148] sm:$0xff] }
  0x5b   :  { %v229_v10 = vld [vmem:[#allocation7 + $0x158] sm:$0xff]  ;;  %v557_v11 = vpack.c.bf16 %v224_v8, %v222_v7  ;;  %v226_v13 = vld [vmem:[#allocation7 + $0x140] sm:$0xff]  ;;  %v228_v14 = vld [vmem:[#allocation7 + $0x150] sm:$0xff] }
  0x5c   :  { %v559_v12 = vpack.c.bf16 %v229_v10, %v227_v9  ;;  %v561_v15 = vpack.c.bf16 %v228_v14, %v226_v13  ;;  %v231_v16 = vld [vmem:[#allocation7 + $0x168] sm:$0xff]  ;;  %v233_v17 = vld [vmem:[#allocation7 + $0x178] sm:$0xff]  ;;  %v230_v19 = vld [vmem:[#allocation7 + $0x160] sm:$0xff] }
  0x5d   :  { %534 = vmatpush1.bf16.msra.mxu1 %v533_v39  ;;  %v563_v18 = vpack.c.bf16 %v233_v17, %v231_v16  ;;  %v232_v20 = vld [vmem:[#allocation7 + $0x170] sm:$0xff]  ;;  %v235_v22 = vld [vmem:[#allocation7 + $0x188] sm:$0xff]  ;;  %v237_v23 = vld [vmem:[#allocation7 + $0x198] sm:$0xff] }
  0x5e   :  { %536 = vmatprep.subr.bf16.mxu1 %v535_v40  ;;  %v565_v21 = vpack.c.bf16 %v232_v20, %v230_v19  ;;  %v567_v24 = vpack.c.bf16 %v237_v23, %v235_v22  ;;  %v234_v25 = vld [vmem:[#allocation7 + $0x180] sm:$0xff]  ;;  %v236_v26 = vld [vmem:[#allocation7 + $0x190] sm:$0xff]  ;;  %v239_v28 = vld [vmem:[#allocation7 + $0x1a8] sm:$0xff] }
  0x5f   :  { %v569_v27 = vpack.c.bf16 %v236_v26, %v234_v25  ;;  %v241_v29 = vld [vmem:[#allocation7 + $0x1b8] sm:$0xff]  ;;  %v238_v30 = vld [vmem:[#allocation7 + $0x1a0] sm:$0xff]  ;;  %v240_v32 = vld [vmem:[#allocation7 + $0x1b0] sm:$0xff] }
  0x60   :  { %v571_v31 = vpack.c.bf16 %v241_v29, %v239_v28  ;;  %v243_v33 = vld [vmem:[#allocation7 + $0x1c8] sm:$0xff]  ;;  %v245_v34 = vld [vmem:[#allocation7 + $0x1d8] sm:$0xff]  ;;  %v573_v35 = vpack.c.bf16 %v240_v32, %v238_v30  ;;  %v242_v37 = vld [vmem:[#allocation7 + $0x1c0] sm:$0xff] }
  0x61   :  { %538 = vmatpush1.bf16.msra.mxu1 %v537_v45  ;;  %v575_v36 = vpack.c.bf16 %v245_v34, %v243_v33  ;;  %v244_v38 = vld [vmem:[#allocation7 + $0x1d0] sm:$0xff]  ;;  %v247_v39 = vld [vmem:[#allocation7 + $0x1e8] sm:$0xff]  ;;  %v249_v40 = vld [vmem:[#allocation7 + $0x1f8] sm:$0xff] }
  0x62   :  { %540 = vmatprep.subr.bf16.mxu1 %v539_v46  ;;  %v577_v41 = vpack.c.bf16 %v244_v38, %v242_v37  ;;  %v579_v42 = vpack.c.bf16 %v249_v40, %v247_v39  ;;  %v246_v43 = vld [vmem:[#allocation7 + $0x1e0] sm:$0xff]  ;;  %v248_v44 = vld [vmem:[#allocation7 + $0x1f0] sm:$0xff]  ;;  %v360_v47 = vld [vmem:[#allocation8 + $0x88] sm:$0xff] }
  0x63   :  { %v581_v45 = vpack.c.bf16 %v248_v44, %v246_v43  ;;  %v359_v46 = vld [vmem:[#allocation8 + $0x80] sm:$0xff]  ;;  %v344_v50 = vld [vmem:[#allocation8 + $0x8] sm:$0xff]  ;;  %v345_v55 = vld [vmem:[#allocation8 + $0x10] sm:$0xff] }
  0x64   :  { %v343_v48 = vld [vmem:[#allocation8] sm:$0xff]  ;;  %v583_v49 = vpack.c.bf16 %v360_v47, %v359_v46  ;;  %v346_v56 = vld [vmem:[#allocation8 + $0x18] sm:$0xff]  ;;  %v348_v62 = vld [vmem:[#allocation8 + $0x28] sm:$0xff] }
  0x65   :  { %542 = vmatpush1.bf16.msra.mxu1 %v541_v51  ;;  %v361_v51 = vld [vmem:[#allocation8 + $0x90] sm:$0xff]  ;;  %v585_v53 = vpack.c.bf16 %v344_v50, %v343_v48  ;;  %v589_v59 = vpack.c.bf16 %v346_v56, %v345_v55  ;;  %v347_v61 = vld [vmem:[#allocation8 + $0x20] sm:$0xff]  ;;  %v89_v3 = vld [vmem:[%s890_s2] sm:$0x3] }
  0x66   :  { %544 = vmatprep.subr.bf16.mxu1 %v543_v52  ;;  %v362_v52 = vld [vmem:[#allocation8 + $0x98] sm:$0xff]  ;;  %584 = vmatprep.subr.bf16.mxu0 %v583_v49  ;;  %v365_v19 = vld [vmem:[#allocation8 + $0xb0] sm:$0xff]  ;;  %v367_v25 = vld [vmem:[#allocation8 + $0xc0] sm:$0xff] }
  0x67   :  { %v587_v54 = vpack.c.bf16 %v362_v52, %v361_v51  ;;  %586 = vmatpush3.bf16.msra.mxu0 %v585_v53  ;;  %v366_v20 = vld [vmem:[#allocation8 + $0xb8] sm:$0xff]  ;;  %v349_v22 = vld [vmem:[#allocation8 + $0x30] sm:$0xff]  ;;  %v368_v26 = vld [vmem:[#allocation8 + $0xc8] sm:$0xff] }
  0x68   :  { %v350_v23 = vld [vmem:[#allocation8 + $0x38] sm:$0xff]  ;;  %v351_v28 = vld [vmem:[#allocation8 + $0x40] sm:$0xff]  ;;  %v352_v29 = vld [vmem:[#allocation8 + $0x48] sm:$0xff] }
  0x69   :  { %546 = vmatpush1.bf16.msra.mxu1 %v545_v57  ;;  %v363_v57 = vld [vmem:[#allocation8 + $0xa0] sm:$0xff]  ;;  %588 = vmatprep.subr.bf16.mxu0 %v587_v54  ;;  %v601_v30 = vpack.c.bf16 %v352_v29, %v351_v28  ;;  %v370_v32 = vld [vmem:[#allocation8 + $0xd8] sm:$0xff]  ;;  %v353_v33 = vld [vmem:[#allocation8 + $0x50] sm:$0xff] }
  0x6a   :  { %548 = vmatprep.subr.bf16.mxu1 %v547_v58  ;;  %v364_v58 = vld [vmem:[#allocation8 + $0xa8] sm:$0xff]  ;;  %v355_v40 = vld [vmem:[#allocation8 + $0x60] sm:$0xff]  ;;  %v374_v43 = vld [vmem:[#allocation8 + $0xf8] sm:$0xff] }
  0x6b   :  { %v591_v60 = vpack.c.bf16 %v364_v58, %v363_v57  ;;  %590 = vmatpush3.bf16.msra.mxu0 %v589_v59  ;;  %v372_v37 = vld [vmem:[#allocation8 + $0xe8] sm:$0xff]  ;;  %v357_v46 = vld [vmem:[#allocation8 + $0x70] sm:$0xff]  ;;  %v358_v47 = vld [vmem:[#allocation8 + $0x78] sm:$0xff] }
  0x6c   :  { %v613_v48 = vpack.c.bf16 %v358_v47, %v357_v46  ;;  %v250_v49 = vld [vmem:[%s892_s4] sm:$0x3] }
  0x6d   :  { %550 = vmatpush1.bf16.msra.mxu1 %v549_v63  ;;  %v593_v63 = vpack.c.bf16 %v348_v62, %v347_v61  ;;  %592 = vmatprep.subr.bf16.mxu0 %v591_v60 }
  0x6e   :  { %552 = vmatprep.subr.bf16.mxu1 %v551_v0  ;;  %v91_v0 = vlaneseq }
  0x6f   :  { %594 = vmatpush3.bf16.msra.mxu0 %v593_v63 }
  0x70   :  { %v855_v1 = vshrl.u32 %v91_v0, 7 }
  0x71   :  { %554 = vmatpush1.bf16.msra.mxu1 %v553_v5 }
  0x72   :  { %556 = vmatprep.subr.bf16.mxu1 %v555_v6  ;;  %v93_v2 = vsub.s32 0, %v855_v1  ;;  %v97_v4 = vsub.s32 1, %v855_v1  ;;  %v475_v1 = vld [vmem:[%s894_s6] ss:$0 sm:$0xff] }
  0x74   :  { %v94_v5 = vrot.slane %v89_v3, %v93_v2  ;;  %v98_v6 = vrot.slane %v89_v3, %v97_v4  ;;  %v255_v50 = vrot.slane %v250_v49, %v93_v2  ;;  %v259_v51 = vrot.slane %v250_v49, %v97_v4 }
  0x75   :  { %558 = vmatpush1.bf16.msra.mxu1 %v557_v11 }
  0x76   :  { %560 = vmatprep.subr.bf16.mxu1 %v559_v12 }
  0x79   :  { %562 = vmatpush1.bf16.msra.mxu1 %v561_v15 }
  0x7a   :  { %564 = vmatprep.subr.bf16.mxu1 %v563_v18 }
  0x7d   :  { %566 = vmatpush1.bf16.msra.mxu1 %v565_v21  ;;  %v595_v21 = vpack.c.bf16 %v366_v20, %v365_v19 }
  0x7e   :  { %568 = vmatprep.subr.bf16.mxu1 %v567_v24  ;;  %v597_v24 = vpack.c.bf16 %v350_v23, %v349_v22 }
  0x7f   :  { %596 = vmatprep.subr.bf16.mxu0 %v595_v21 }
  0x80   :  { %598 = vmatpush3.bf16.msra.mxu0 %v597_v24 }
  0x81   :  { %570 = vmatpush1.bf16.msra.mxu1 %v569_v27  ;;  %v599_v27 = vpack.c.bf16 %v368_v26, %v367_v25 }
  0x82   :  { %572 = vmatprep.subr.bf16.mxu1 %v571_v31  ;;  %v369_v31 = vld [vmem:[#allocation8 + $0xd0] sm:$0xff] }
  0x83   :  { %600 = vmatprep.subr.bf16.mxu0 %v599_v27  ;;  %v603_v34 = vpack.c.bf16 %v370_v32, %v369_v31 }
  0x84   :  { %602 = vmatpush3.bf16.msra.mxu0 %v601_v30 }
  0x85   :  { %574 = vmatpush1.bf16.msra.mxu1 %v573_v35  ;;  %v354_v35 = vld [vmem:[#allocation8 + $0x58] sm:$0xff]  ;;  %604 = vmatprep.subr.bf16.mxu0 %v603_v34 }
  0x86   :  { %576 = vmatprep.subr.bf16.mxu1 %v575_v36  ;;  %v371_v36 = vld [vmem:[#allocation8 + $0xe0] sm:$0xff]  ;;  %v605_v38 = vpack.c.bf16 %v354_v35, %v353_v33 }
  0x87   :  { %v607_v39 = vpack.c.bf16 %v372_v37, %v371_v36 }
  0x88   :  { %606 = vmatpush3.bf16.msra.mxu0 %v605_v38 }
  0x89   :  { %578 = vmatpush1.bf16.msra.mxu1 %v577_v41  ;;  %v356_v41 = vld [vmem:[#allocation8 + $0x68] sm:$0xff]  ;;  %608 = vmatprep.subr.bf16.mxu0 %v607_v39 }
  0x8a   :  { %580 = vmatprep.subr.bf16.mxu1 %v579_v42  ;;  %v373_v42 = vld [vmem:[#allocation8 + $0xf0] sm:$0xff]  ;;  %v609_v44 = vpack.c.bf16 %v356_v41, %v355_v40 }
  0x8c   :  { %610 = vmatpush3.bf16.msra.mxu0 %v609_v44 }
  0x8d   :  { %582 = vmatpush1.bf16.msra.mxu1 %v581_v45  ;;  %v611_v45 = vpack.c.bf16 %v374_v43, %v373_v42 }
  0x8f   :  { %612 = vmatprep.subr.bf16.mxu0 %v611_v45 }
  0x90   :  { %614 = vmatpush3.bf16.msra.mxu0 %v613_v48 }
 0x128   :  { %v171_v7 = vpop.f32.mrb[0].mxu0 }
 0x129   :  { %v172_v8 = vadd.f32 %v171_v7, %v94_v5  ;;  %v173_v9 = vpop.f32.mrb[1].mxu0 }
 0x12a   :  { %v174_v10 = vadd.f32 %v173_v9, %v98_v6 }
 0x12b   :  { %v176_v11 = vmul.f32 1.442695, %v172_v8  ;;  %vm182_vm2 = vcmp.gt.f32.partialorder %v172_v8, 0.0 }
 0x12c   :  { %v178_v12 = vmul.f32 1.442695, %v174_v10  ;;  %vm183_vm1 = vcmp.gt.f32.partialorder %v174_v10, 0.0 }
 0x12d   :  { %625 = vpow2.f32 %v176_v11 }
 0x12e   :  { %627 = vpow2.f32 %v178_v12 }
 0x137   :  { %v626_v13 = vpop.eup %625 }
 0x138   :  { %v628_v14 = vpop.eup %627  ;;  %v471_v15 = vadd.f32 -1.0, %v626_v13 }
 0x139   :  { %v472_v16 = vadd.f32 -1.0, %v628_v14 }
 0x13a   :  { %v184_v18 = vsel %vm182_vm2, %v172_v8, %v471_v15 }
 0x13b   :  { %v185_v17 = vsel %vm183_vm1, %v174_v10, %v472_v16 }
 0x13c   :  { %326 = vmatprep.mubr.f32.mxu1 %v185_v17 }
 0x13d   :  { %327 = vmatmul.mubr.f32.vlgmr.msra.gmra.mrb[0].mxu1 %v184_v18 }
 0x210   :  { %v328_v52 = vpop.f32.mrb[0].mxu1 }
 0x211   :  { %v329_v53 = vadd.f32 %v328_v52, %v255_v50  ;;  %v330_v54 = vpop.f32.mrb[1].mxu1 }
 0x212   :  { %v331_v55 = vadd.f32 %v330_v54, %v259_v51 }
 0x213   :  { %v333_v56 = vmul.f32 1.442695, %v329_v53  ;;  %vm339_vm4 = vcmp.gt.f32.partialorder %v329_v53, 0.0 }
 0x214   :  { %v335_v57 = vmul.f32 1.442695, %v331_v55  ;;  %vm340_vm3 = vcmp.gt.f32.partialorder %v331_v55, 0.0 }
 0x215   :  { %629 = vpow2.f32 %v333_v56 }
 0x216   :  { %631 = vpow2.f32 %v335_v57 }
 0x21f   :  { %v630_v58 = vpop.eup %629 }
 0x220   :  { %v632_v59 = vpop.eup %631  ;;  %v473_v60 = vadd.f32 -1.0, %v630_v58 }
 0x221   :  { %v474_v61 = vadd.f32 -1.0, %v632_v59 }
 0x222   :  { %v341_v63 = vsel %vm339_vm4, %v329_v53, %v473_v60 }
 0x223   :  { %v342_v62 = vsel %vm340_vm3, %v331_v55, %v474_v61 }
 0x224   :  { %446 = vmatprep.mubr.f32.mxu0 %v342_v62 }
 0x225   :  { %447 = vmatmul.mubr.f32.vlgmr.msra.gmra.mrb[2].mxu0 %v341_v63 }
 0x2f8   :  { %v508_v0 = vpop.f32.mrb[2].mxu0 }
 0x2f9   :  { %v509_v2 = vpop.f32.mrb[3].mxu0 }
 0x2fa   :  { %v510_v3 = vadd.f32 %v509_v2, %v508_v0 }
 0x2fc   :  { %v449_v4 = vadd.f32 %v510_v3, %v475_v1 }
 0x2fe   :  { %452 = vst [vmem:[#allocation10] sm:$0xff] %v449_v4 }
 0x2ff   :  { %732 = shalt.err (!%p729_p8)
}
 0x300   :  { %s733_s13 = scalar_lea.hbm %s895_s7, 128 }
 0x301   :  { %p734_p9 = scmp.ne.s32.totalorder %s895_s7, %s733_s13  ;;  %p737_p10 = scmp.lt.u32.totalorder %s733_s13, %s895_s7 }
 0x303   :  { %p739_p11 = pnand %p737_p10, %p734_p9 }
 0x305   :  { %742 = shalt.err (!%p739_p11)
}
 0x306   :  { %462 = dma.vmem_to_hbm [thread:$0]  %s460_s30, 128, %s895_s7, [#allocation4]  }
 0x307   :  { %749 = dma.done.wait [#allocation4], 128  }
 0x308   :  { %750 = vsyncadd [#allocation4], 4294967168 }
 0x309   :  { %466 = vsyncpa [#allocation3], 1 }
 0x30a   :  { %467 = vsyncpa [#allocation6], 1 }
 0x30b   :  { %468 = vsyncpa [#allocation9], 1 }
 0x30c   :  { %469 = vsyncpa [#allocation4], 1 }

</bundles_post_ra>
